<compile_context>
chip_gen: v7x
topology: tpu7x:2x2x1
jax: 0.10.0
libtpu: 0.0.40
codegen_flags: <defaults>
</compile_context>

<pallas_src>
import jax
import jax.numpy as jnp
from jax.experimental import pallas as pl
from jax.experimental.pallas import tpu as pltpu  # noqa: F401  (TPU backend assumed)

M, K, N = 3, 4, 5        # rows, in_features, out_features
PACK_ROWS = 8            # one sublane-aligned tile: rows 0..K-1 = w_t, K..K+M-1 = c


def _fused_kernel(x_ref, p_ref, o_ref):
    """o = clip(x @ W^T + c, 0, 1); w_t and c are static views into one packed tile."""
    x = x_ref[...]                      # [M, K] f32
    w_t = p_ref[0:K, :]                 # [K, N] f32  (static slice -> free view)
    c = p_ref[K:K + M, :]               # [M, N] f32  (precomputed param@W^T + bias)
    y = jnp.dot(x, w_t, preferred_element_type=jnp.float32) + c
    o_ref[...] = jnp.clip(y, 0.0, 1.0).astype(o_ref.dtype)


def prepare_params(param, weight, bias):
    """One-time (module-init) folding of all x-independent terms into ONE buffer.

    param:  [M, K]   weight: [N, K] (PyTorch layout)   bias: [N]
    Returns packed [PACK_ROWS, N] f32: rows 0..K-1 = W^T, rows K..K+M-1 = param@W^T + bias.
    """
    w_t = weight.T.astype(jnp.float32)                          # [K, N], off hot path
    c = (param.astype(jnp.float32) @ w_t
         + bias.astype(jnp.float32).reshape(1, N))              # [M, N]
    packed = jnp.zeros((PACK_ROWS, N), dtype=jnp.float32)
    packed = packed.at[0:K, :].set(w_t)
    packed = packed.at[K:K + M, :].set(c)
    return packed


@jax.jit
def my_module_forward(x, packed):
    """x: broadcastable to [M, K]; packed: [PACK_ROWS, N] from prepare_params."""
    x = jnp.broadcast_to(x, (M, K)).astype(jnp.float32)  # fused under jit, no extra dispatch
    return pl.pallas_call(
        _fused_kernel,
        out_shape=jax.ShapeDtypeStruct((M, N), jnp.float32),
        in_specs=[
            pl.BlockSpec((M, K), lambda: (0, 0)),
            pl.BlockSpec((PACK_ROWS, N), lambda: (0, 0)),
        ],
        out_specs=pl.BlockSpec((M, N), lambda: (0, 0)),
        cost_estimate=pl.CostEstimate(
            flops=2 * M * K * N + M * N,
            transcendentals=0,
            bytes_accessed=4 * (M * K + PACK_ROWS * N + M * N),
        ),
    )(x, packed)


if __name__ == "__main__":
    key = jax.random.PRNGKey(0)
    kx, kp, kw, kb = jax.random.split(key, 4)

    # Deterministic "parameters" (shapes from MyModule.__init__).
    param = jax.random.uniform(kp, (M, K), dtype=jnp.float32)                 # torch.rand(3, 4)
    weight = jax.random.uniform(kw, (N, K), dtype=jnp.float32) * 0.5 - 0.25   # Linear(4, 5).weight
    bias = jax.random.uniform(kb, (N,), dtype=jnp.float32) * 0.5 - 0.25       # Linear(4, 5).bias

    # Example input consistent with forward (broadcastable with param): [3, 4].
    x = jax.random.normal(kx, (M, K), dtype=jnp.float32)

    # Init-time folding (outside the per-call path).
    packed = prepare_params(param, weight, bias)

    out = my_module_forward(x, packed)
    out = jax.block_until_ready(out)

    # Reference check against the original (unfolded) math in plain JAX.
    # NOTE: folding c = param@W^T + bias reassociates the fp32 sum -> tolerance check.
    ref = jnp.clip((x + param) @ weight.T + bias, 0.0, 1.0)
    assert out.shape == (M, N)
    assert jnp.allclose(out, ref, atol=1e-5), "mismatch vs reference"
    print("KERNEL_OK")
</pallas_src>

<mosaic_0001>
module attributes {stable_mosaic.version = 11 : i64} {
  func.func @_fused_kernel(%arg0: memref<3x4xf32, #tpu.memory_space<vmem>>, %arg1: memref<8x5xf32, #tpu.memory_space<vmem>>, %arg2: memref<3x5xf32, #tpu.memory_space<vmem>>) attributes {dimension_semantics = [], scalar_prefetch = 0 : i64, scratch_operands = 0 : i64, tpu.core_type = #tpu.core_type<tc>} {
    %c0 = arith.constant 0 : index
    %c0_0 = arith.constant 0 : index
    %0 = vector.load %arg0[%c0, %c0_0] : memref<3x4xf32, #tpu.memory_space<vmem>>, vector<3x4xf32>
    %c0_1 = arith.constant 0 : index
    %c0_2 = arith.constant 0 : index
    %1 = vector.load %arg1[%c0_1, %c0_2] : memref<8x5xf32, #tpu.memory_space<vmem>>, vector<4x5xf32>
    %c4 = arith.constant 4 : index
    %c0_3 = arith.constant 0 : index
    %2 = vector.load %arg1[%c4, %c0_3] : memref<8x5xf32, #tpu.memory_space<vmem>>, vector<3x5xf32>
    %cst = arith.constant dense<0.000000e+00> : vector<3x5xf32>
    %3 = tpu.matmul %0, %1, %cst {dimension_numbers = #tpu.dot_dimension_numbers<[1], [0], [0], [1], [0, 0, 1, 1], [], []>} : vector<3x4xf32>, vector<4x5xf32>, vector<3x5xf32> -> vector<3x5xf32>
    %4 = arith.addf %3, %2 : vector<3x5xf32>
    %cst_4 = arith.constant 0.000000e+00 : f32
    %cst_5 = arith.constant 1.000000e+00 : f32
    %5 = vector.broadcast %cst_4 : f32 to vector<3x5xf32>
    %6 = arith.maximumf %5, %4 : vector<3x5xf32>
    %7 = vector.broadcast %cst_5 : f32 to vector<3x5xf32>
    %8 = arith.minimumf %7, %6 : vector<3x5xf32>
    %c0_6 = arith.constant 0 : index
    %c0_7 = arith.constant 0 : index
    %9 = vector.load %arg2[%c0_6, %c0_7] : memref<3x5xf32, #tpu.memory_space<vmem>>, vector<3x5xf32>
    tpu.vector_store %arg2[%c0_6, %c0_7], %8 {strides = array<i32>} : memref<3x5xf32, #tpu.memory_space<vmem>>, vector<3x5xf32>,
    return
  }
}

</mosaic_0001>

<bundles_post_ra>
// kernel: my_module_forward.1
= control target key start
LH: loop header
LB: loop body
LE: loop exit
PB: predicated region body
PF: predicated region fallthrough
CT: control target
= control target key end

     0   :  { %7 = vsyncpa [#allocation3], 0  ;;  %s279_s0 = inlined_call_operand.hbm [shape: f32[3,4], index: 0, kind: input, shape index: {}]   ;;  %s280_s1 = inlined_call_operand.hbm [shape: f32[8,5], index: 1, kind: input, shape index: {}]   ;;  %s281_s2 = inlined_call_operand.hbm [shape: f32[3,5], index: 2, kind: output, shape index: {}]  }
   0x1   :  { %8 = vsyncpa [#allocation6], 0 }
   0x2   :  { %9 = vsyncpa [#allocation4], 0  ;;  %s223_s9 = smov [#allocation2]   ;;  %s224_s11 = smov [#allocation5]  }
   0x3   :  { %s16_s10 = sshll.u32 %s223_s9, 4  ;;  %s26_s12 = sshll.u32 %s224_s11, 4  ;;  %s17_s10 = int_to_ptr.vmem [resolvable:$true] %s16_s10  ;;  %s27_s12 = int_to_ptr.vmem [resolvable:$true] %s26_s12 }
   0x4   :  { %s151_s15 = scalar_lea.hbm %s279_s0, 64 }
   0x5   :  { %p152_p0 = scmp.ne.s32.totalorder %s279_s0, %s151_s15  ;;  %p155_p1 = scmp.lt.u32.totalorder %s151_s15, %s279_s0 }
   0x7   :  { %p157_p2 = pnand %p155_p1, %p152_p0 }
   0x9   :  { %160 = shalt.err (!%p157_p2)
}
   0xa   :  { %s161_s20 = scalar_lea.vmem %s17_s10, 64  ;;  %p166_p4 = scmp.lt.s32.totalorder %s17_s10, %s17_s10 }
   0xb   :  { %p162_p3 = scmp.ne.s32.totalorder %s17_s10, %s161_s20  ;;  %p167_p5 = scmp.lt.s32.totalorder %s161_s20, %s161_s20 }
   0xd   :  { %p168_p6 = por %p167_p5, %p166_p4 }
   0xf   :  { %p169_p7 = pnand %p168_p6, %p162_p3 }
  0x11   :  { %172 = shalt.err (!%p169_p7)
}
  0x12   :  { %19 = dma.hbm_to_vmem [thread:$0]  %s279_s0, 64, %s17_s10, [#allocation3]  }
  0x13   :  { %s173_s25 = scalar_lea.hbm %s280_s1, 128 }
  0x14   :  { %p174_p8 = scmp.ne.s32.totalorder %s280_s1, %s173_s25  ;;  %p177_p9 = scmp.lt.u32.totalorder %s173_s25, %s280_s1 }
  0x16   :  { %p179_p10 = pnand %p177_p9, %p174_p8 }
  0x18   :  { %182 = shalt.err (!%p179_p10)
}
  0x19   :  { %s183_s30 = scalar_lea.vmem %s27_s12, 128  ;;  %p188_p12 = scmp.lt.s32.totalorder %s27_s12, %s27_s12 }
  0x1a   :  { %p184_p11 = scmp.ne.s32.totalorder %s27_s12, %s183_s30  ;;  %p189_p13 = scmp.lt.s32.totalorder %s183_s30, %s183_s30 }
  0x1c   :  { %p190_p0 = por %p189_p13, %p188_p12 }
  0x1e   :  { %p191_p1 = pnand %p190_p0, %p184_p11 }
  0x20   :  { %194 = shalt.err (!%p191_p1)
}
  0x21   :  { %29 = dma.hbm_to_vmem [thread:$0]  %s280_s1, 128, %s27_s12, [#allocation6]  }
  0x22   :  { %217 = dma.done.wait [#allocation3], 64  }
  0x23   :  { %218 = vsyncadd [#allocation3], 4294967232 }
  0x24   :  { %219 = dma.done.wait [#allocation6], 128  }
  0x25   :  { %220 = vsyncadd [#allocation6], 4294967168  ;;  %v225_v0 = vmov 0.0   ;;  %vm226_vm0 = vmmov 0   ;;  %vm43_vm1 = vcmask 1043456   ;;  %vm39_vm2 = vcmask 31744  }
  0x26   :  { %141 = vmatprep.subr.mxu0 %v225_v0  ;;  %143 = vmatprep.mubr.msk.f32.mxu0 %vm226_vm0, %v225_v0  ;;  %v37_v1 = vld [vmem:[#allocation5] sm:$0xf]  ;;  %v36_v2 = vld [vmem:[#allocation2] sm:$0x7]  ;;  %v38_v3 = vld [vmem:[#allocation5 + $0x4] sm:$0x7] }
  0x27   :  { %142 = vmatpush3.msk.msra.mxu0 %vm43_vm1, %v37_v1  ;;  %s227_s4 = smov [#allocation7]   ;;  %vm119_vm3 = vcmask 34816  }
  0x28   :  { %144 = vmatmul.mubr.msk.f32.vlgmr.msra.gmra.mrb[0].mxu0 %vm39_vm2, %v36_v2  ;;  %s127_s1 = sshll.u32 %s227_s4, 4  ;;  %s128_s1 = int_to_ptr.vmem [resolvable:$true] %s127_s1 }
  0x29   :  { %s195_s5 = scalar_lea.vmem %s128_s1, 64  ;;  %p200_p3 = scmp.lt.s32.totalorder %s128_s1, %s128_s1 }
  0x2a   :  { %p196_p2 = scmp.ne.s32.totalorder %s128_s1, %s195_s5  ;;  %p201_p4 = scmp.lt.s32.totalorder %s195_s5, %s195_s5 }
  0x2c   :  { %p202_p5 = por %p201_p4, %p200_p3 }
  0x2e   :  { %p203_p6 = pnand %p202_p5, %p196_p2 }
  0xfb   :  { %v113_v4 = vpop.f32.mrb[0].mxu0 }
  0xfc   :  { %v114_v5 = vadd.f32 %v113_v4, %v38_v3  ;;  %v145_v6 = vpop.f32.mrb[1].mxu0 }
  0xfe   :  { %v117_v7 = vmax.f32 %v114_v5, 0.0 }
 0x100   :  { %v118_v8 = vmin.f32 %v117_v7, 1.0 }
 0x102   :  { %120 = vst.msk [vmem:[#allocation7] sm:$0x7] %vm119_vm3, %v118_v8 }
 0x103   :  { %206 = shalt.err (!%p203_p6)
}
 0x104   :  { %s207_s8 = scalar_lea.hbm %s281_s2, 64 }
 0x105   :  { %p208_p7 = scmp.ne.s32.totalorder %s281_s2, %s207_s8  ;;  %p211_p8 = scmp.lt.u32.totalorder %s207_s8, %s281_s2 }
 0x107   :  { %p213_p9 = pnand %p211_p8, %p208_p7 }
 0x109   :  { %216 = shalt.err (!%p213_p9)
}
 0x10a   :  { %130 = dma.vmem_to_hbm [thread:$0]  %s128_s1, 64, %s281_s2, [#allocation4]  }
 0x10b   :  { %221 = dma.done.wait [#allocation4], 64  }
 0x10c   :  { %222 = vsyncadd [#allocation4], 4294967232 }
 0x10d   :  { %134 = vsyncpa [#allocation3], 1 }
 0x10e   :  { %135 = vsyncpa [#allocation6], 1 }
 0x10f   :  { %136 = vsyncpa [#allocation4], 1 }

</bundles_post_ra>
